<compile_context>
chip_gen: v7x
topology: tpu7x:2x2x1
jax: 0.10.0
libtpu: 0.0.40
codegen_flags: <defaults>
</compile_context>

<pallas_src>
import math

import jax
import jax.numpy as jnp
from jax.experimental import pallas as pl
from jax.experimental.pallas import tpu as pltpu

# ----- "config" -----
HIDDEN = 32
NUM_HEADS = 4
HEAD_DIM = HIDDEN // NUM_HEADS
INTERMEDIATE = 64
NUM_LAYERS = 2
LN_EPS = 1e-12

# Storage dtype of the big weight matrices and the MXU operand dtype.
# jnp.float32 matches the PyTorch reference; jnp.bfloat16 for v6e/v7x throughput.
MATMUL_DTYPE = jnp.float32


def _layer_norm(x, gamma, beta):
    mean = jnp.mean(x, axis=-1, keepdims=True)
    var = jnp.mean(jnp.square(x - mean), axis=-1, keepdims=True)
    return (x - mean) * jax.lax.rsqrt(var + LN_EPS) * gamma + beta


def _erf(x):
    # Abramowitz & Stegun 7.1.26 (|error| <= 1.5e-7): matches the erf-based GELU of
    # the reference.  The divide runs on the EUP via approx reciprocal.
    a1, a2, a3, a4, a5 = (0.254829592, -0.284496736, 1.421413741,
                          -1.453152027, 1.061405429)
    p = 0.3275911
    ax = jnp.abs(x)
    t = pl.reciprocal(1.0 + p * ax, approx=True)
    poly = ((((a5 * t + a4) * t + a3) * t + a2) * t + a1) * t
    y = 1.0 - poly * jnp.exp(-ax * ax)
    return jnp.where(x < 0.0, -y, y)


def _gelu(x):
    return 0.5 * x * (1.0 + _erf(x * 0.7071067811865476))


def _make_layer_kernel(seq, num_heads, head_dim):
    hidden = num_heads * head_dim
    scale = 1.0 / math.sqrt(head_dim)

    def kernel(h_in_ref, mask_ref, wqkv_ref, bqkv_ref, wo_ref, wi_ref, wo2_ref,
               vech_ref, bi_ref, out_ref):
        layer = pl.program_id(1)

        # Layer 0: seed the VMEM-resident hidden state for this batch element.
        @pl.when(layer == 0)
        def _():
            out_ref[...] = h_in_ref[...]

        h = out_ref[0]                                      # (S, H) f32, resident
        vech = vech_ref[0]                                  # (6, H) f32
        bo, ln1g, ln1b = vech[0:1], vech[1:2], vech[2:3]
        bo2, ln2g, ln2b = vech[3:4], vech[4:5], vech[5:6]

        # ---- Fused QKV projection, computed in transposed (3H, S) orientation ----
        hm = h.astype(MATMUL_DTYPE)
        qkv_t = jnp.einsum('oh,sh->os', wqkv_ref[0], hm,
                           preferred_element_type=jnp.float32) + bqkv_ref[0]
        # (3H, S) -> (3*NH, DH, S): splits only the major (sublane) dim -> no relayout.
        qkv3 = qkv_t.reshape(3 * num_heads, head_dim, seq)
        q_t = qkv3[0:num_heads].astype(MATMUL_DTYPE)            # (NH, DH, S)
        k_t = qkv3[num_heads:2 * num_heads].astype(MATMUL_DTYPE)
        v_t = qkv3[2 * num_heads:].astype(MATMUL_DTYPE)
        q3 = jnp.swapaxes(q_t, 1, 2)                            # (NH, S, DH)

        # ---- Scaled dot-product attention, all heads batched ----
        scores = jnp.einsum('hqd,hdk->hqk', q3, k_t,
                            preferred_element_type=jnp.float32) * scale
        scores = scores + mask_ref[...]                         # (1,1,S) key-pad mask
        scores = scores - jnp.max(scores, axis=-1, keepdims=True)
        p = jnp.exp(scores)                                     # softmax in f32
        p = p * pl.reciprocal(jnp.sum(p, axis=-1, keepdims=True), approx=True)

        ctx_t = jnp.einsum('hdk,hqk->hdq', v_t, p.astype(MATMUL_DTYPE),
                           preferred_element_type=jnp.float32)  # (NH, DH, S)
        # Merge heads (major-dim merge) then one 2-D transpose back to (S, H).
        ctx = jnp.swapaxes(ctx_t.reshape(hidden, seq), 0, 1)

        # ---- BertSelfOutput: single (S,H)@(H,H) + residual + LayerNorm ----
        attn = jnp.dot(ctx.astype(MATMUL_DTYPE), wo_ref[0],
                       preferred_element_type=jnp.float32) + bo
        h1 = _layer_norm(attn + h, ln1g, ln1b)

        # ---- BertIntermediate (erf GELU) + BertOutput ----
        inter = _gelu(jnp.dot(h1.astype(MATMUL_DTYPE), wi_ref[0],
                              preferred_element_type=jnp.float32) + bi_ref[0])
        out2 = jnp.dot(inter.astype(MATMUL_DTYPE), wo2_ref[0],
                       preferred_element_type=jnp.float32) + bo2
        out_ref[0] = _layer_norm(out2 + h1, ln2g, ln2b)

    return kernel


def bert_encoder(hidden_states, attention_mask, packed_params):
    """BertEncoder.forward (output_hidden_states=output_attentions=False,
    split_lengths=None, dropout=identity).  attention_mask: additive (B, 1, 1, S).
    Returns (final_hidden_states,)."""
    B, S, H = hidden_states.shape
    wqkv_t, bqkv_t, wo, wi, wo2, vech, bi = packed_params
    L = wqkv_t.shape[0]
    NH, DH, I = NUM_HEADS, HEAD_DIM, wi.shape[2]

    h3 = hidden_states.astype(jnp.float32)
    mask3 = attention_mask.reshape(B, 1, S).astype(jnp.float32)

    def batch_ix(b, l):
        return (b, 0, 0)

    def layer_ix(b, l):
        return (l, 0, 0)

    in_specs = [
        pl.BlockSpec((1, S, H), batch_ix),        # input hidden (seed at layer 0)
        pl.BlockSpec((1, 1, S), batch_ix),        # additive key-padding mask
        pl.BlockSpec((1, 3 * H, H), layer_ix),    # fused QKV weight (torch [out, in])
        pl.BlockSpec((1, 3 * H, 1), layer_ix),    # fused QKV bias (transposed)
        pl.BlockSpec((1, H, H), layer_ix),        # attention output weight [in, out]
        pl.BlockSpec((1, H, I), layer_ix),        # intermediate weight [in, out]
        pl.BlockSpec((1, I, H), layer_ix),        # output weight [in, out]
        pl.BlockSpec((1, 6, H), layer_ix),        # [bo, ln1_g, ln1_b, bo2, ln2_g, ln2_b]
        pl.BlockSpec((1, 1, I), layer_ix),        # intermediate bias
    ]
    out_spec = pl.BlockSpec((1, S, H), batch_ix)  # constant over l -> VMEM-resident

    # Advisory cost / VMEM hints.
    flops_step = (2 * S * H * 3 * H + 2 * 2 * NH * S * S * DH
                  + 2 * S * H * H + 2 * 2 * S * H * I)
    trans_step = NH * S * S + 2 * S * I + 2 * S
    wbytes = sum(int(p.size) * p.dtype.itemsize for p in packed_params) // L
    step_bytes = wbytes + 3 * S * H * 4 + S * 4
    cost = pl.CostEstimate(flops=int(B * L * flops_step),
                           transcendentals=int(B * L * trans_step),
                           bytes_accessed=int(B * L * step_bytes))
    scratch_bytes = 4 * (NH * S * S + 3 * H * S + 4 * S * H + 2 * S * I)
    vmem_limit = int(min(64 * 1024 * 1024,
                         max(32 * 1024 * 1024, 4 * step_bytes + scratch_bytes)))

    out = pl.pallas_call(
        _make_layer_kernel(S, NH, DH),
        out_shape=jax.ShapeDtypeStruct((B, S, H), jnp.float32),
        grid=(B, L),
        in_specs=in_specs,
        out_specs=out_spec,
        compiler_params=pltpu.CompilerParams(
            dimension_semantics=("parallel", "arbitrary"),
            vmem_limit_bytes=vmem_limit),
        cost_estimate=cost,
    )(h3, mask3, *packed_params)

    return (out,)


def init_layer_params(key):
    """Per-layer parameters; weight matrices in the natural [in, out] Linear layout
    (== torch weight.T)."""
    ks = jax.random.split(key, 8)
    std = 0.02
    return dict(
        wq=std * jax.random.normal(ks[0], (HIDDEN, HIDDEN), jnp.float32),
        wk=std * jax.random.normal(ks[1], (HIDDEN, HIDDEN), jnp.float32),
        wv=std * jax.random.normal(ks[2], (HIDDEN, HIDDEN), jnp.float32),
        wo=std * jax.random.normal(ks[3], (HIDDEN, HIDDEN), jnp.float32),
        wi=std * jax.random.normal(ks[4], (HIDDEN, INTERMEDIATE), jnp.float32),
        wo2=std * jax.random.normal(ks[5], (INTERMEDIATE, HIDDEN), jnp.float32),
        bq=0.01 * jax.random.normal(ks[6], (HIDDEN,), jnp.float32),
        bk=jnp.zeros((HIDDEN,), jnp.float32),
        bv=0.01 * jax.random.normal(ks[7], (HIDDEN,), jnp.float32),
        bo=jnp.zeros((HIDDEN,), jnp.float32),
        bi=jnp.zeros((INTERMEDIATE,), jnp.float32),
        bo2=jnp.zeros((HIDDEN,), jnp.float32),
        ln1_g=jnp.ones((HIDDEN,), jnp.float32),
        ln1_b=jnp.zeros((HIDDEN,), jnp.float32),
        ln2_g=jnp.ones((HIDDEN,), jnp.float32),
        ln2_b=jnp.zeros((HIDDEN,), jnp.float32),
    )


def pack_encoder_params(layer_params):
    """Stack per-layer params along a leading [L] axis, fuse Q/K/V into one weight,
    and pack the 12 small vectors into 3 arrays.

    Returns (wqkv_t, bqkv_t, wo, wi, wo2, vech, bi):
      wqkv_t: (L, 3H, H) torch [out, in] layout; rows = [q | k | v], head-major within.
      bqkv_t: (L, 3H, 1)
      wo/wi/wo2: (L, H, H) / (L, H, I) / (L, I, H) in [in, out] layout.
      vech:   (L, 6, H) = [bo, ln1_g, ln1_b, bo2, ln2_g, ln2_b]
      bi:     (L, 1, I)
    Big matrices are stored in MATMUL_DTYPE (bfloat16 halves weight DMA on v6e/v7x);
    vectors stay f32.
    """
    def stack(name):
        return jnp.stack([lp[name] for lp in layer_params], axis=0)

    wqkv_t = jnp.concatenate([jnp.swapaxes(stack('wq'), 1, 2),
                              jnp.swapaxes(stack('wk'), 1, 2),
                              jnp.swapaxes(stack('wv'), 1, 2)], axis=1)  # (L, 3H, H)
    bqkv_t = jnp.concatenate([stack('bq'), stack('bk'), stack('bv')],
                             axis=1)[..., None]                          # (L, 3H, 1)
    vech = jnp.stack([stack('bo'), stack('ln1_g'), stack('ln1_b'),
                      stack('bo2'), stack('ln2_g'), stack('ln2_b')], axis=1)
    bi = stack('bi')[:, None, :]

    def to_md(w):
        return w.astype(MATMUL_DTYPE)

    return (to_md(wqkv_t), bqkv_t.astype(jnp.float32),
            to_md(stack('wo')), to_md(stack('wi')), to_md(stack('wo2')),
            vech.astype(jnp.float32), bi.astype(jnp.float32))


if __name__ == "__main__":
    B, S = 2, 8
    root = jax.random.PRNGKey(0)
    k_h, k_layers = jax.random.split(root)

    hidden_states = jax.random.normal(k_h, (B, S, HIDDEN), jnp.float32)

    # Standard BERT extended mask: additive (B, 1, 1, S); last 2 tokens of batch
    # element 1 are padding.
    valid = jnp.ones((B, S), jnp.float32).at[1, -2:].set(0.0)
    attention_mask = (1.0 - valid)[:, None, None, :] * -10000.0   # (B, 1, 1, S)

    layer_keys = jax.random.split(k_layers, NUM_LAYERS)
    packed = pack_encoder_params([init_layer_params(k) for k in layer_keys])

    outputs = bert_encoder(hidden_states, attention_mask, packed)
    final_hidden = jax.block_until_ready(outputs[0])
    assert final_hidden.shape == (B, S, HIDDEN)
    assert bool(jnp.all(jnp.isfinite(final_hidden)))
    print("KERNEL_OK")
</pallas_src>

<mosaic_0001>
module attributes {stable_mosaic.version = 11 : i64} {
  func.func @kernel(%arg0: i32, %arg1: i32, %arg2: memref<1x8x32xf32, #tpu.memory_space<vmem>>, %arg3: memref<1x1x8xf32, #tpu.memory_space<vmem>>, %arg4: memref<1x96x32xf32, #tpu.memory_space<vmem>>, %arg5: memref<1x96x1xf32, #tpu.memory_space<vmem>>, %arg6: memref<1x32x32xf32, #tpu.memory_space<vmem>>, %arg7: memref<1x32x64xf32, #tpu.memory_space<vmem>>, %arg8: memref<1x64x32xf32, #tpu.memory_space<vmem>>, %arg9: memref<1x6x32xf32, #tpu.memory_space<vmem>>, %arg10: memref<1x1x64xf32, #tpu.memory_space<vmem>>, %arg11: memref<1x8x32xf32, #tpu.memory_space<vmem>>) attributes {dimension_semantics = [#tpu.dimension_semantics<parallel>, #tpu.dimension_semantics<arbitrary>], iteration_bounds = array<i64: 2, 2>, scalar_prefetch = 0 : i64, scratch_operands = 0 : i64, tpu.core_type = #tpu.core_type<tc>, window_params = [{transform_indices = @transform_0, window_bounds = array<i64: 1, 8, 32>}, {transform_indices = @transform_1, window_bounds = array<i64: 1, 1, 8>}, {transform_indices = @transform_2, window_bounds = array<i64: 1, 96, 32>}, {transform_indices = @transform_3, window_bounds = array<i64: 1, 96, 1>}, {transform_indices = @transform_4, window_bounds = array<i64: 1, 32, 32>}, {transform_indices = @transform_5, window_bounds = array<i64: 1, 32, 64>}, {transform_indices = @transform_6, window_bounds = array<i64: 1, 64, 32>}, {transform_indices = @transform_7, window_bounds = array<i64: 1, 6, 32>}, {transform_indices = @transform_8, window_bounds = array<i64: 1, 1, 64>}, {transform_indices = @transform_9, window_bounds = array<i64: 1, 8, 32>}]} {
    %c0_i32 = arith.constant 0 : i32
    %0 = arith.cmpi eq, %arg1, %c0_i32 : i32
    %1 = arith.extui %0 : i1 to i32
    %c0_i32_0 = arith.constant 0 : i32
    %2 = arith.cmpi ne, %1, %c0_i32_0 : i32
    scf.if %2 {
      %c0_62 = arith.constant 0 : index
      %c0_63 = arith.constant 0 : index
      %c0_64 = arith.constant 0 : index
      %149 = vector.load %arg2[%c0_62, %c0_63, %c0_64] : memref<1x8x32xf32, #tpu.memory_space<vmem>>, vector<1x8x32xf32>
      %c0_65 = arith.constant 0 : index
      %c0_66 = arith.constant 0 : index
      %c0_67 = arith.constant 0 : index
      %150 = vector.load %arg11[%c0_65, %c0_66, %c0_67] : memref<1x8x32xf32, #tpu.memory_space<vmem>>, vector<1x8x32xf32>
      tpu.vector_store %arg11[%c0_65, %c0_66, %c0_67], %149 {strides = array<i32>} : memref<1x8x32xf32, #tpu.memory_space<vmem>>, vector<1x8x32xf32>,
    } else {
    }
    %c0 = arith.constant 0 : index
    %c0_1 = arith.constant 0 : index
    %c0_2 = arith.constant 0 : index
    %3 = vector.load %arg11[%c0, %c0_1, %c0_2] : memref<1x8x32xf32, #tpu.memory_space<vmem>>, vector<1x8x32xf32>
    %4 = vector.shape_cast %3 : vector<1x8x32xf32> to vector<8x32xf32>
    %c0_3 = arith.constant 0 : index
    %c0_4 = arith.constant 0 : index
    %c0_5 = arith.constant 0 : index
    %5 = vector.load %arg9[%c0_3, %c0_4, %c0_5] : memref<1x6x32xf32, #tpu.memory_space<vmem>>, vector<1x6x32xf32>
    %6 = vector.shape_cast %5 : vector<1x6x32xf32> to vector<6x32xf32>
    %7 = vector.extract_strided_slice %6 {offsets = [0, 0], sizes = [1, 32], strides = [1, 1]} : vector<6x32xf32> to vector<1x32xf32>
    %8 = vector.extract_strided_slice %6 {offsets = [1, 0], sizes = [1, 32], strides = [1, 1]} : vector<6x32xf32> to vector<1x32xf32>
    %9 = vector.extract_strided_slice %6 {offsets = [2, 0], sizes = [1, 32], strides = [1, 1]} : vector<6x32xf32> to vector<1x32xf32>
    %10 = vector.extract_strided_slice %6 {offsets = [3, 0], sizes = [1, 32], strides = [1, 1]} : vector<6x32xf32> to vector<1x32xf32>
    %11 = vector.extract_strided_slice %6 {offsets = [4, 0], sizes = [1, 32], strides = [1, 1]} : vector<6x32xf32> to vector<1x32xf32>
    %12 = vector.extract_strided_slice %6 {offsets = [5, 0], sizes = [1, 32], strides = [1, 1]} : vector<6x32xf32> to vector<1x32xf32>
    %c0_6 = arith.constant 0 : index
    %c0_7 = arith.constant 0 : index
    %c0_8 = arith.constant 0 : index
    %13 = vector.load %arg4[%c0_6, %c0_7, %c0_8] : memref<1x96x32xf32, #tpu.memory_space<vmem>>, vector<1x96x32xf32>
    %14 = vector.shape_cast %13 : vector<1x96x32xf32> to vector<96x32xf32>
    "tpu.trace_start"() <{level = 10 : i32, message = "oh,sh->os"}> : () -> ()
    %cst = arith.constant dense<0.000000e+00> : vector<96x8xf32>
    %15 = tpu.matmul %14, %4, %cst {dimension_numbers = #tpu.dot_dimension_numbers<[1], [1], [0], [0], [0, 0, 1, 0], [], []>} : vector<96x32xf32>, vector<8x32xf32>, vector<96x8xf32> -> vector<96x8xf32>
    "tpu.trace_stop"() : () -> ()
    %c0_9 = arith.constant 0 : index
    %c0_10 = arith.constant 0 : index
    %c0_11 = arith.constant 0 : index
    %16 = vector.load %arg5[%c0_9, %c0_10, %c0_11] : memref<1x96x1xf32, #tpu.memory_space<vmem>>, vector<1x96x1xf32>
    %17 = vector.shape_cast %16 : vector<1x96x1xf32> to vector<96x1xf32>
    %18 = vector.broadcast %17 : vector<96x1xf32> to vector<96x8xf32>
    %19 = arith.addf %15, %18 : vector<96x8xf32>
    %20 = vector.shape_cast %19 : vector<96x8xf32> to vector<12x8x8xf32>
    %21 = vector.extract_strided_slice %20 {offsets = [0, 0, 0], sizes = [4, 8, 8], strides = [1, 1, 1]} : vector<12x8x8xf32> to vector<4x8x8xf32>
    %22 = vector.extract_strided_slice %20 {offsets = [4, 0, 0], sizes = [4, 8, 8], strides = [1, 1, 1]} : vector<12x8x8xf32> to vector<4x8x8xf32>
    %23 = vector.extract_strided_slice %20 {offsets = [8, 0, 0], sizes = [4, 8, 8], strides = [1, 1, 1]} : vector<12x8x8xf32> to vector<4x8x8xf32>
    %24 = tpu.transpose %21, [0, 2, 1] : vector<4x8x8xf32> -> vector<4x8x8xf32>
    "tpu.trace_start"() <{level = 10 : i32, message = "hqd,hdk->hqk"}> : () -> ()
    %cst_12 = arith.constant dense<0.000000e+00> : vector<4x8x8xf32>
    %25 = tpu.matmul %24, %22, %cst_12 {dimension_numbers = #tpu.dot_dimension_numbers<[2], [1], [1], [2], [0, 0, 0, 1, 1, 2], [0], [0]>} : vector<4x8x8xf32>, vector<4x8x8xf32>, vector<4x8x8xf32> -> vector<4x8x8xf32>
    "tpu.trace_stop"() : () -> ()
    %cst_13 = arith.constant 0.353553385 : f32
    %26 = vector.broadcast %cst_13 : f32 to vector<4x8x8xf32>
    %27 = arith.mulf %25, %26 : vector<4x8x8xf32>
    %c0_14 = arith.constant 0 : index
    %c0_15 = arith.constant 0 : index
    %c0_16 = arith.constant 0 : index
    %28 = vector.load %arg3[%c0_14, %c0_15, %c0_16] : memref<1x1x8xf32, #tpu.memory_space<vmem>>, vector<1x1x8xf32>
    %29 = vector.broadcast %28 : vector<1x1x8xf32> to vector<4x8x8xf32>
    %30 = arith.addf %27, %29 : vector<4x8x8xf32>
    %cst_17 = arith.constant dense<0xFF800000> : vector<4x8xf32>
    %31 = vector.multi_reduction <maximumf>, %30, %cst_17 [2] : vector<4x8x8xf32> to vector<4x8xf32>
    %32 = vector.shape_cast %31 : vector<4x8xf32> to vector<4x8x1xf32>
    %33 = vector.broadcast %32 : vector<4x8x1xf32> to vector<4x8x8xf32>
    %34 = arith.subf %30, %33 : vector<4x8x8xf32>
    %35 = math.exp %34 : vector<4x8x8xf32>
    %cst_18 = arith.constant dense<0.000000e+00> : vector<4x8xf32>
    %36 = vector.multi_reduction <add>, %35, %cst_18 [2] : vector<4x8x8xf32> to vector<4x8xf32>
    %37 = vector.shape_cast %36 : vector<4x8xf32> to vector<4x8x1xf32>
    %38 = tpu.reciprocal %37 {approx = true} : vector<4x8x1xf32> -> vector<4x8x1xf32>
    %39 = vector.broadcast %38 : vector<4x8x1xf32> to vector<4x8x8xf32>
    %40 = arith.mulf %35, %39 : vector<4x8x8xf32>
    "tpu.trace_start"() <{level = 10 : i32, message = "hdk,hqk->hdq"}> : () -> ()
    %cst_19 = arith.constant dense<0.000000e+00> : vector<4x8x8xf32>
    %41 = tpu.matmul %23, %40, %cst_19 {dimension_numbers = #tpu.dot_dimension_numbers<[2], [2], [1], [1], [0, 0, 0, 1, 1, 1], [0], [0]>} : vector<4x8x8xf32>, vector<4x8x8xf32>, vector<4x8x8xf32> -> vector<4x8x8xf32>
    "tpu.trace_stop"() : () -> ()
    %42 = vector.shape_cast %41 : vector<4x8x8xf32> to vector<32x8xf32>
    %43 = tpu.transpose %42, [1, 0] : vector<32x8xf32> -> vector<8x32xf32>
    %c0_20 = arith.constant 0 : index
    %c0_21 = arith.constant 0 : index
    %c0_22 = arith.constant 0 : index
    %44 = vector.load %arg6[%c0_20, %c0_21, %c0_22] : memref<1x32x32xf32, #tpu.memory_space<vmem>>, vector<1x32x32xf32>
    %45 = vector.shape_cast %44 : vector<1x32x32xf32> to vector<32x32xf32>
    %cst_23 = arith.constant dense<0.000000e+00> : vector<8x32xf32>
    %46 = tpu.matmul %43, %45, %cst_23 {dimension_numbers = #tpu.dot_dimension_numbers<[1], [0], [0], [1], [0, 0, 1, 1], [], []>} : vector<8x32xf32>, vector<32x32xf32>, vector<8x32xf32> -> vector<8x32xf32>
    %47 = vector.broadcast %7 : vector<1x32xf32> to vector<8x32xf32>
    %48 = arith.addf %46, %47 : vector<8x32xf32>
    %49 = arith.addf %48, %4 : vector<8x32xf32>
    %cst_24 = arith.constant dense<0.000000e+00> : vector<8xf32>
    %50 = vector.multi_reduction <add>, %49, %cst_24 [1] : vector<8x32xf32> to vector<8xf32>
    %51 = vector.shape_cast %50 : vector<8xf32> to vector<8x1xf32>
    %cst_25 = arith.constant 3.200000e+01 : f32
    %52 = vector.broadcast %cst_25 : f32 to vector<8x1xf32>
    %53 = arith.divf %51, %52 : vector<8x1xf32>
    %54 = vector.broadcast %53 : vector<8x1xf32> to vector<8x32xf32>
    %55 = arith.subf %49, %54 : vector<8x32xf32>
    %56 = arith.mulf %55, %55 : vector<8x32xf32>
    %cst_26 = arith.constant dense<0.000000e+00> : vector<8xf32>
    %57 = vector.multi_reduction <add>, %56, %cst_26 [1] : vector<8x32xf32> to vector<8xf32>
    %58 = vector.shape_cast %57 : vector<8xf32> to vector<8x1xf32>
    %cst_27 = arith.constant 3.200000e+01 : f32
    %59 = vector.broadcast %cst_27 : f32 to vector<8x1xf32>
    %60 = arith.divf %58, %59 : vector<8x1xf32>
    %61 = vector.broadcast %53 : vector<8x1xf32> to vector<8x32xf32>
    %62 = arith.subf %49, %61 : vector<8x32xf32>
    %cst_28 = arith.constant 9.99999996E-13 : f32
    %63 = vector.broadcast %cst_28 : f32 to vector<8x1xf32>
    %64 = arith.addf %60, %63 : vector<8x1xf32>
    %65 = math.rsqrt %64 : vector<8x1xf32>
    %66 = vector.broadcast %65 : vector<8x1xf32> to vector<8x32xf32>
    %67 = arith.mulf %62, %66 : vector<8x32xf32>
    %68 = vector.broadcast %8 : vector<1x32xf32> to vector<8x32xf32>
    %69 = arith.mulf %67, %68 : vector<8x32xf32>
    %70 = vector.broadcast %9 : vector<1x32xf32> to vector<8x32xf32>
    %71 = arith.addf %69, %70 : vector<8x32xf32>
    %c0_29 = arith.constant 0 : index
    %c0_30 = arith.constant 0 : index
    %c0_31 = arith.constant 0 : index
    %72 = vector.load %arg7[%c0_29, %c0_30, %c0_31] : memref<1x32x64xf32, #tpu.memory_space<vmem>>, vector<1x32x64xf32>
    %73 = vector.shape_cast %72 : vector<1x32x64xf32> to vector<32x64xf32>
    %cst_32 = arith.constant dense<0.000000e+00> : vector<8x64xf32>
    %74 = tpu.matmul %71, %73, %cst_32 {dimension_numbers = #tpu.dot_dimension_numbers<[1], [0], [0], [1], [0, 0, 1, 1], [], []>} : vector<8x32xf32>, vector<32x64xf32>, vector<8x64xf32> -> vector<8x64xf32>
    %c0_33 = arith.constant 0 : index
    %c0_34 = arith.constant 0 : index
    %c0_35 = arith.constant 0 : index
    %75 = vector.load %arg10[%c0_33, %c0_34, %c0_35] : memref<1x1x64xf32, #tpu.memory_space<vmem>>, vector<1x1x64xf32>
    %76 = vector.shape_cast %75 : vector<1x1x64xf32> to vector<1x64xf32>
    %77 = vector.broadcast %76 : vector<1x64xf32> to vector<8x64xf32>
    %78 = arith.addf %74, %77 : vector<8x64xf32>
    %cst_36 = arith.constant 5.000000e-01 : f32
    %79 = vector.broadcast %cst_36 : f32 to vector<8x64xf32>
    %80 = arith.mulf %79, %78 : vector<8x64xf32>
    %cst_37 = arith.constant 0.707106769 : f32
    %81 = vector.broadcast %cst_37 : f32 to vector<8x64xf32>
    %82 = arith.mulf %78, %81 : vector<8x64xf32>
    %83 = math.absf %82 : vector<8x64xf32>
    %cst_38 = arith.constant 0.327591091 : f32
    %84 = vector.broadcast %cst_38 : f32 to vector<8x64xf32>
    %85 = arith.mulf %84, %83 : vector<8x64xf32>
    %cst_39 = arith.constant 1.000000e+00 : f32
    %86 = vector.broadcast %cst_39 : f32 to vector<8x64xf32>
    %87 = arith.addf %86, %85 : vector<8x64xf32>
    %88 = tpu.reciprocal %87 {approx = true} : vector<8x64xf32> -> vector<8x64xf32>
    %cst_40 = arith.constant 1.06140542 : f32
    %89 = vector.broadcast %cst_40 : f32 to vector<8x64xf32>
    %90 = arith.mulf %89, %88 : vector<8x64xf32>
    %cst_41 = arith.constant -1.45315206 : f32
    %91 = vector.broadcast %cst_41 : f32 to vector<8x64xf32>
    %92 = arith.addf %90, %91 : vector<8x64xf32>
    %93 = arith.mulf %92, %88 : vector<8x64xf32>
    %cst_42 = arith.constant 1.42141378 : f32
    %94 = vector.broadcast %cst_42 : f32 to vector<8x64xf32>
    %95 = arith.addf %93, %94 : vector<8x64xf32>
    %96 = arith.mulf %95, %88 : vector<8x64xf32>
    %cst_43 = arith.constant -0.284496725 : f32
    %97 = vector.broadcast %cst_43 : f32 to vector<8x64xf32>
    %98 = arith.addf %96, %97 : vector<8x64xf32>
    %99 = arith.mulf %98, %88 : vector<8x64xf32>
    %cst_44 = arith.constant 0.254829586 : f32
    %100 = vector.broadcast %cst_44 : f32 to vector<8x64xf32>
    %101 = arith.addf %99, %100 : vector<8x64xf32>
    %102 = arith.mulf %101, %88 : vector<8x64xf32>
    %cst_45 = arith.constant 0.000000e+00 : f32
    %103 = vector.broadcast %cst_45 : f32 to vector<8x64xf32>
    %104 = arith.subf %103, %83 : vector<8x64xf32>
    %105 = arith.mulf %104, %83 : vector<8x64xf32>
    %106 = math.exp %105 : vector<8x64xf32>
    %107 = arith.mulf %102, %106 : vector<8x64xf32>
    %cst_46 = arith.constant 1.000000e+00 : f32
    %108 = vector.broadcast %cst_46 : f32 to vector<8x64xf32>
    %109 = arith.subf %108, %107 : vector<8x64xf32>
    %cst_47 = arith.constant 0.000000e+00 : f32
    %110 = vector.broadcast %cst_47 : f32 to vector<8x64xf32>
    %111 = arith.cmpf olt, %82, %110 : vector<8x64xf32>
    %cst_48 = arith.constant 0.000000e+00 : f32
    %112 = vector.broadcast %cst_48 : f32 to vector<8x64xf32>
    %113 = arith.subf %112, %109 : vector<8x64xf32>
    %114 = arith.select %111, %113, %109 : vector<8x64xi1>, vector<8x64xf32>
    %cst_49 = arith.constant 1.000000e+00 : f32
    %115 = vector.broadcast %cst_49 : f32 to vector<8x64xf32>
    %116 = arith.addf %115, %114 : vector<8x64xf32>
    %117 = arith.mulf %80, %116 : vector<8x64xf32>
    %c0_50 = arith.constant 0 : index
    %c0_51 = arith.constant 0 : index
    %c0_52 = arith.constant 0 : index
    %118 = vector.load %arg8[%c0_50, %c0_51, %c0_52] : memref<1x64x32xf32, #tpu.memory_space<vmem>>, vector<1x64x32xf32>
    %119 = vector.shape_cast %118 : vector<1x64x32xf32> to vector<64x32xf32>
    %cst_53 = arith.constant dense<0.000000e+00> : vector<8x32xf32>
    %120 = tpu.matmul %117, %119, %cst_53 {dimension_numbers = #tpu.dot_dimension_numbers<[1], [0], [0], [1], [0, 0, 1, 1], [], []>} : vector<8x64xf32>, vector<64x32xf32>, vector<8x32xf32> -> vector<8x32xf32>
    %121 = vector.broadcast %10 : vector<1x32xf32> to vector<8x32xf32>
    %122 = arith.addf %120, %121 : vector<8x32xf32>
    %123 = arith.addf %122, %71 : vector<8x32xf32>
    %cst_54 = arith.constant dense<0.000000e+00> : vector<8xf32>
    %124 = vector.multi_reduction <add>, %123, %cst_54 [1] : vector<8x32xf32> to vector<8xf32>
    %125 = vector.shape_cast %124 : vector<8xf32> to vector<8x1xf32>
    %cst_55 = arith.constant 3.200000e+01 : f32
    %126 = vector.broadcast %cst_55 : f32 to vector<8x1xf32>
    %127 = arith.divf %125, %126 : vector<8x1xf32>
    %128 = vector.broadcast %127 : vector<8x1xf32> to vector<8x32xf32>
    %129 = arith.subf %123, %128 : vector<8x32xf32>
    %130 = arith.mulf %129, %129 : vector<8x32xf32>
    %cst_56 = arith.constant dense<0.000000e+00> : vector<8xf32>
    %131 = vector.multi_reduction <add>, %130, %cst_56 [1] : vector<8x32xf32> to vector<8xf32>
    %132 = vector.shape_cast %131 : vector<8xf32> to vector<8x1xf32>
    %cst_57 = arith.constant 3.200000e+01 : f32
    %133 = vector.broadcast %cst_57 : f32 to vector<8x1xf32>
    %134 = arith.divf %132, %133 : vector<8x1xf32>
    %135 = vector.broadcast %127 : vector<8x1xf32> to vector<8x32xf32>
    %136 = arith.subf %123, %135 : vector<8x32xf32>
    %cst_58 = arith.constant 9.99999996E-13 : f32
    %137 = vector.broadcast %cst_58 : f32 to vector<8x1xf32>
    %138 = arith.addf %134, %137 : vector<8x1xf32>
    %139 = math.rsqrt %138 : vector<8x1xf32>
    %140 = vector.broadcast %139 : vector<8x1xf32> to vector<8x32xf32>
    %141 = arith.mulf %136, %140 : vector<8x32xf32>
    %142 = vector.broadcast %11 : vector<1x32xf32> to vector<8x32xf32>
    %143 = arith.mulf %141, %142 : vector<8x32xf32>
    %144 = vector.broadcast %12 : vector<1x32xf32> to vector<8x32xf32>
    %145 = arith.addf %143, %144 : vector<8x32xf32>
    %c0_59 = arith.constant 0 : index
    %c0_60 = arith.constant 0 : index
    %c0_61 = arith.constant 0 : index
    %146 = vector.load %arg11[%c0_59, %c0_60, %c0_61] : memref<1x8x32xf32, #tpu.memory_space<vmem>>, vector<1x8x32xf32>
    %147 = vector.shape_cast %146 : vector<1x8x32xf32> to vector<8x32xf32>
    %148 = vector.shape_cast %145 : vector<8x32xf32> to vector<1x8x32xf32>
    tpu.vector_store %arg11[%c0_59, %c0_60, %c0_61], %148 {strides = array<i32>} : memref<1x8x32xf32, #tpu.memory_space<vmem>>, vector<1x8x32xf32>,
    return
  }
  func.func @transform_0(%arg0: i32, %arg1: i32) -> (i32, i32, i32) {
    %c0_i32 = arith.constant 0 : i32
    %c0_i32_0 = arith.constant 0 : i32
    %c0_i32_1 = arith.constant 0 : i32
    return %arg0, %c0_i32, %c0_i32_0 : i32, i32, i32
  }
  func.func @transform_1(%arg0: i32, %arg1: i32) -> (i32, i32, i32) {
    %c0_i32 = arith.constant 0 : i32
    %c0_i32_0 = arith.constant 0 : i32
    %c0_i32_1 = arith.constant 0 : i32
    return %arg0, %c0_i32, %c0_i32_0 : i32, i32, i32
  }
  func.func @transform_2(%arg0: i32, %arg1: i32) -> (i32, i32, i32) {
    %c0_i32 = arith.constant 0 : i32
    %c0_i32_0 = arith.constant 0 : i32
    %c0_i32_1 = arith.constant 0 : i32
    return %arg1, %c0_i32, %c0_i32_0 : i32, i32, i32
  }
  func.func @transform_3(%arg0: i32, %arg1: i32) -> (i32, i32, i32) {
    %c0_i32 = arith.constant 0 : i32
    %c0_i32_0 = arith.constant 0 : i32
    %c0_i32_1 = arith.constant 0 : i32
    return %arg1, %c0_i32, %c0_i32_0 : i32, i32, i32
  }
  func.func @transform_4(%arg0: i32, %arg1: i32) -> (i32, i32, i32) {
    %c0_i32 = arith.constant 0 : i32
    %c0_i32_0 = arith.constant 0 : i32
    %c0_i32_1 = arith.constant 0 : i32
    return %arg1, %c0_i32, %c0_i32_0 : i32, i32, i32
  }
  func.func @transform_5(%arg0: i32, %arg1: i32) -> (i32, i32, i32) {
    %c0_i32 = arith.constant 0 : i32
    %c0_i32_0 = arith.constant 0 : i32
    %c0_i32_1 = arith.constant 0 : i32
    return %arg1, %c0_i32, %c0_i32_0 : i32, i32, i32
  }
  func.func @transform_6(%arg0: i32, %arg1: i32) -> (i32, i32, i32) {
    %c0_i32 = arith.constant 0 : i32
    %c0_i32_0 = arith.constant 0 : i32
    %c0_i32_1 = arith.constant 0 : i32
    return %arg1, %c0_i32, %c0_i32_0 : i32, i32, i32
  }
  func.func @transform_7(%arg0: i32, %arg1: i32) -> (i32, i32, i32) {
    %c0_i32 = arith.constant 0 : i32
    %c0_i32_0 = arith.constant 0 : i32
    %c0_i32_1 = arith.constant 0 : i32
    return %arg1, %c0_i32, %c0_i32_0 : i32, i32, i32
  }
  func.func @transform_8(%arg0: i32, %arg1: i32) -> (i32, i32, i32) {
    %c0_i32 = arith.constant 0 : i32
    %c0_i32_0 = arith.constant 0 : i32
    %c0_i32_1 = arith.constant 0 : i32
    return %arg1, %c0_i32, %c0_i32_0 : i32, i32, i32
  }
  func.func @transform_9(%arg0: i32, %arg1: i32) -> (i32, i32, i32) {
    %c0_i32 = arith.constant 0 : i32
    %c0_i32_0 = arith.constant 0 : i32
    %c0_i32_1 = arith.constant 0 : i32
    return %arg0, %c0_i32, %c0_i32_0 : i32, i32, i32
  }
}

</mosaic_0001>

<bundles_post_ra>
// kernel: tpu_custom_call.1
= control target key start
LH: loop header
LB: loop body
LE: loop exit
PB: predicated region body
PF: predicated region fallthrough
CT: control target
= control target key end

     0   :  { %s2883_s0 = inlined_call_operand.vmem [shape: f32[2,8,32], index: 0, kind: input, shape index: {}]   ;;  %s2884_s1 = inlined_call_operand.vmem [shape: f32[2,1,8], index: 1, kind: input, shape index: {}]   ;;  %s2885_s2 = inlined_call_operand.vmem [shape: f32[2,96,32], index: 2, kind: input, shape index: {}]   ;;  %s2886_s3 = inlined_call_operand.vmem [shape: f32[2,96,1], index: 3, kind: input, shape index: {}]   ;;  %s2887_s4 = inlined_call_operand.vmem [shape: f32[2,32,32], index: 4, kind: input, shape index: {}]   ;;  %s2888_s5 = inlined_call_operand.vmem [shape: f32[2,32,64], index: 5, kind: input, shape index: {}]   ;;  %s2889_s6 = inlined_call_operand.vmem [shape: f32[2,64,32], index: 6, kind: input, shape index: {}]   ;;  %s2890_s7 = inlined_call_operand.vmem [shape: f32[2,6,32], index: 7, kind: input, shape index: {}]   ;;  %s2891_s8 = inlined_call_operand.vmem [shape: f32[2,1,64], index: 8, kind: input, shape index: {}]   ;;  %s2892_s9 = inlined_call_operand.hbm [shape: f32[2,8,32], index: 9, kind: output, shape index: {}]  }
   0x1   :  { %2906 = sst [smem:[#allocation16_spill]] %s2883_s0 }
   0x2   :  { %2907 = sst [smem:[#allocation17_spill]] %s2885_s2 }
   0x3   :  { %2908 = sst [smem:[#allocation18_spill]] %s2886_s3 }
   0x4   :  { %2909 = sst [smem:[#allocation19_spill]] %s2892_s9 }
   0x5   :  { %14 = vsyncpa [#allocation3], 0 }
   0x6   :  { %16 = vsyncpa [#allocation3 + $0x1], 0  ;;  %s2540_s30 = smov 0   ;;  %s2542_s10 = smov 0  }
   0x7   :  { %s2544_s11 = smov 0   ;;  %s2546_s12 = smov 0  }
   0x8   :  { %s2548_s13 = smov 0   ;;  %s2550_s14 = smov 0  }
   0x9   :  { %s2552_s15 = smov 0   ;;  %s2554_s16 = smov 0  }
   0xa LB: > { %2910 = sst [smem:[#allocation5_spill]] %s2455_s30  ;;  %s2060_s17 = sadd.s32 4294967295, %s2483_s16   ;;  %s2483_s16 = sphi %s2554_s16, %s22_s16   ;;  %s2479_s15 = sphi %s2552_s15, %s2940_s15   ;;  %s2475_s14 = sphi %s2550_s14, %s2939_s14   ;;  %s2471_s13 = sphi %s2548_s13, %s2938_s13   ;;  %s2467_s12 = sphi %s2546_s12, %s2937_s12   ;;  %s2463_s11 = sphi %s2544_s11, %s2936_s11   ;;  %s2459_s10 = sphi %s2542_s10, %s2935_s10   ;;  %s2455_s30 = sphi %s2540_s30, %s2934_s30  }
   0xb   : > { %2911 = sst [smem:[#allocation6_spill]] %s2459_s10  ;;  %s2061_s18 = sadd.s32 4294967294, %s2483_s16  }
   0xc   : > { %2912 = sst [smem:[#allocation7_spill]] %s2463_s11  ;;  %s31_s19 = sadd.s32 1, %s2475_s14 }
   0xd   : > { %2913 = sst [smem:[#allocation8_spill]] %s2475_s14  ;;  %p32_p0 = scmp.ge.s32.totalorder %s31_s19, 2 }
   0xe   : > { %2914 = sst [smem:[#allocation9_spill]] %s2479_s15  ;;  %s34_s20 = sadd.s32 1, %s2479_s15 }
   0xf   : > { %2915 = sst [smem:[#allocation10_spill]] %s2483_s16  ;;  %p285_p1 = scmp.ne.s32.totalorder %s2463_s11, %s2459_s10 }
  0x10   : > { %p286_p2 = scmp.eq.s32.totalorder %s2060_s17, 3  ;;  %s2942_s19 = smov (%p32_p0, %s31_s19), 0 }
  0x11   : > { %2916 = sst [smem:[#allocation11_spill]] %s2942_s19  ;;  %s2944_s20 = smov (!%p32_p0, %s34_s20), %s2479_s15 }
  0x12   : > { %p2589_p3 = por %p286_p2, %p285_p1  ;;  %p291_p4 = scmp.ne.s32.totalorder %s2459_s10, %s2455_s30 }
  0x13   : > { %p36_p5 = scmp.ge.s32.totalorder %s2944_s20, 2  ;;  %p292_p6 = scmp.eq.s32.totalorder %s2061_s18, 3 }
  0x14   : > { %s2917_s21 = scalar_select %p2589_p3, 1, 0 }
  0x15   : > { %p2064_p7 = scmp.ge.s32.totalorder %s2483_s16, 1  ;;  %p376_p8 = scmp.lt.s32.totalorder %s2483_s16, 5 }
  0x16   : > { %2918 = sst [smem:[#allocation12_spill]] %s2917_s21  ;;  %s2946_s20 = smov (%p36_p5, %s2944_s20), 0 }
  0x17   : > { %2919 = sst [smem:[#allocation13_spill]] %s2946_s20  ;;  %p2599_p9 = por %p292_p6, %p291_p4 }
  0x18   : > { %p377_p10 = pnand %p2064_p7, %p376_p8  ;;  %s272_s23 = ssub.s32 %s2479_s15, %s2946_s20 }
  0x19   : > { %s2920_s22 = scalar_select %p2599_p9, 1, 0 }
  0x1a   : > { %s275_s24 = sadd.s32 1, %s2463_s11  ;;  %p273_p11 = scmp.eq.s32.totalorder %s272_s23, 0 }
  0x1b   : > { %2921 = sst [smem:[#allocation14_spill]] %s2920_s22  ;;  %380 = sbr.rel (%p377_p10) target bundleno = 2610 (0xa32), region = 56 }
  0x1c   : > { %s2607_s25 = scalar_select %p273_p11, %s2463_s11, %s275_s24  }
  0x1d   : > { %s2894_s26 = sand.u32 (!%p377_p10), 1, %s2459_s10   ;;  %p446_p12 = scmp.lt.s32.totalorder (!%p377_p10), %s2471_s13, 1 }
  0x1e   : > { %2922 = sst [smem:[#allocation15_spill]] %s2607_s25  ;;  %s2065_s27 = sshll.u32 (!%p377_p10), %s2894_s26, 3 }
  0x1f   : > { %p453_p13 = scmp.lt.s32.totalorder (!%p377_p10), %s2467_s12, 1  ;;  %s2923_s0 = sld [smem:[#allocation16_spill]] (!%p377_p10) }
  0x20   : > { %s2924_s2 = sld [smem:[#allocation17_spill]] (!%p377_p10)  ;;  %s2925_s3 = sld [smem:[#allocation18_spill]] (!%p377_p10) }
  0x21   : > { %p2076_p0 = scmp.ne.s32.totalorder (!%p377_p10), %s2467_s12, 0 }
  0x22   : > { %s2615_s28 = scalar_select %p446_p12, %s2471_s13, 1 }
  0x23   : > { %s2618_s29 = scalar_select %p453_p13, %s2467_s12, 1 }
  0x24   : > { %s2066_s17 = sshll.u32 %s2615_s28, 3  ;;  %vm490_vm0 = vcmask (!%p2076_p0), 261120  }
  0x25   : > { %s449_s26 = scalar_lea.vmem %s2923_s0, %s2066_s17  ;;  %s2287_s15 = smul.u32 96, %s2618_s29 }
  0x26   : > { %s2111_s14 = sshll.u32 %s2618_s29, 5  ;;  %s2113_s25 = sshll.u32 %s2618_s29, 6  ;;  %v489_v0 = vld [vmem:[%s449_s26] sm:$0xff] (!%p2076_p0) }
  0x27   : > { %s2634_s30 = scalar_lea.vmem %s2924_s2, %s2287_s15  ;;  %s2639_s21 = scalar_lea.vmem %s2925_s3, %s2287_s15 }
  0x28   : > { %s2644_s23 = scalar_lea.vmem %s2887_s4, %s2111_s14  ;;  %s2649_s17 = scalar_lea.vmem %s2888_s5, %s2111_s14 }
  0x29   : > { %s2654_s11 = scalar_lea.vmem %s2889_s6, %s2113_s25  ;;  %s2075_s22 = sshll.u32 %s2618_s29, 3 }
  0x2a   : > { %s2660_s15 = scalar_lea.vmem %s2890_s7, %s2075_s22  ;;  %s484_s18 = scalar_lea.vmem %s2891_s8, %s2618_s29 }
  0x2b   : > { %s2666_s3 = scalar_lea.vmem [#allocation2], %s2065_s27  ;;  %488 = sbr.rel (%p2076_p0) target bundleno = 50 (0x32), region = 60 }
  0x2c   : > { %491 = vst.msk [vmem:[%s2666_s3] sm:$0xff] (!%p2076_p0), %vm490_vm0, %v489_v0 }
  0x32 PF: > { %vm578_vm1 = vcmask 261120   ;;  %v494_v2 = vld [vmem:[%s2634_s30] sm:$0xff]  ;;  %v495_v3 = vld [vmem:[%s2634_s30 + $0x8] sm:$0xff]  ;;  %v2485_v4 = vmov 0   ;;  %v496_v5 = vld [vmem:[%s2634_s30 + $0x10] sm:$0xff]  ;;  %v2486_v19 = vmov 0.0   ;;  %s2926_s12 = scalar_lea.vmem %s2884_s1, %s2615_s28 }
  0x33   : > { %v2671_v1 = vld [vmem:[%s2666_s3] sm:$0xff]  ;;  %2164 = vmatprep.mubr.msk.f32.mxu0 %vm578_vm1, %v494_v2  ;;  %2363 = vset.pattern.permute.xlu0 %v2485_v4  ;;  %v508_v7 = vld [vmem:[%s2639_s21 + $0x10] sm:$0xff]  ;;  %v509_v9 = vld [vmem:[%s2639_s21 + $0x18] sm:$0xff]  ;;  %vm2487_vm2 = vmmov 0   ;;  %vm871_vm3 = vcmask 64512   ;;  %vm1787_vm5 = vcmask 523264  }
  0x34   : > { %2162 = vmatprep.subr.msk.mxu0 %vm578_vm1, %v2671_v1  ;;  %v506_v6 = vld [vmem:[%s2639_s21] sm:$0xff]  ;;  %2364 = vset.pattern.permute.xlu1 %v2485_v4  ;;  %v507_v8 = vld [vmem:[%s2639_s21 + $0x8] sm:$0xff]  ;;  %v497_v10 = vld [vmem:[%s2634_s30 + $0x18] sm:$0xff]  ;;  %s2108_s26 = sshll.u32 %s2471_s13, 7  ;;  %s1900_s27 = sshll.u32 %s2666_s3, 4  ;;  %s2828_s27 = int_to_ptr.vmem [resolvable:$true] %s1900_s27 }
  0x35   : > { %2163 = vmatpush3.xpose.msk.msra.mxu0 %vm578_vm1, %v2671_v1  ;;  %520 = vperm.xlu0 %2363, %v506_v6   ;;  %v498_v11 = vld [vmem:[%s2634_s30 + $0x20] sm:$0xff]  ;;  %v511_v13 = vld [vmem:[%s2639_s21 + $0x28] sm:$0xff]  ;;  %v500_v15 = vld [vmem:[%s2634_s30 + $0x30] sm:$0xff]  ;;  %s2929_s24 = sld [smem:[#allocation19_spill]]  ;;  %s2489_s13 = smov [#allocation2]  }
  0x36   : > { %530 = vperm.xlu1 %2364, %v508_v7   ;;  %v510_v12 = vld [vmem:[%s2639_s21 + $0x20] sm:$0xff]  ;;  %v499_v14 = vld [vmem:[%s2634_s30 + $0x28] sm:$0xff]  ;;  %v512_v16 = vld [vmem:[%s2639_s21 + $0x30] sm:$0xff]  ;;  %2182 = vmatprep.subr.mxu1 %v2486_v19 }
  0x37   : > { %v513_v17 = vld [vmem:[%s2639_s21 + $0x38] sm:$0xff]  ;;  %2217 = vmatprep.subr.mxu0 %v2486_v19  ;;  %2184 = vmatprep.mubr.msk.f32.mxu1 %vm2487_vm2, %v2486_v19  ;;  %v502_v38 = vld [vmem:[%s2634_s30 + $0x40] sm:$0xff]  ;;  %v503_v39 = vld [vmem:[%s2634_s30 + $0x48] sm:$0xff] }
  0x38   : > { %2165 = vmatmul.mubr.msk.f32.vlgmr.msra.gmra.mrb[0].mxu0 %vm578_vm1, %v495_v3  ;;  %v501_v18 = vld [vmem:[%s2634_s30 + $0x38] sm:$0xff]  ;;  %v504_v50 = vld [vmem:[%s2634_s30 + $0x50] sm:$0xff]  ;;  %v2094_v53 = vld [vmem:[%s2926_s12] ss:$0 sm:$0xff] }
  0x39   : > { %2167 = vmatprep.mubr.msk.f32.mxu0 %vm578_vm1, %v496_v5  ;;  %525 = vperm.xlu0 %2363, %v507_v8   ;;  %v505_v51 = vld [vmem:[%s2634_s30 + $0x58] sm:$0xff] }
  0x3a   : > { %535 = vperm.xlu1 %2364, %v509_v9  }
  0x3c   : > { %2168 = vmatmul.mubr.msk.f32.gmra.mrb[2].mxu0 %vm578_vm1, %v497_v10  ;;  %v514_v10 = vld [vmem:[%s2639_s21 + $0x40] sm:$0xff] }
  0x3d   : > { %2170 = vmatprep.mubr.msk.f32.mxu0 %vm578_vm1, %v498_v11  ;;  %540 = vperm.xlu0 %2363, %v510_v12  }
  0x3e   : > { %545 = vperm.xlu1 %2364, %v511_v13  }
  0x40   : > { %2171 = vmatmul.mubr.msk.f32.gmra.mrb[4].mxu0 %vm578_vm1, %v499_v14 }
  0x41   : > { %2173 = vmatprep.mubr.msk.f32.mxu0 %vm578_vm1, %v500_v15  ;;  %550 = vperm.xlu0 %2363, %v512_v16  }
  0x42   : > { %555 = vperm.xlu1 %2364, %v513_v17  }
  0x44   : > { %2174 = vmatmul.mubr.msk.f32.gmra.mrb[6].mxu0 %vm578_vm1, %v501_v18 }
  0x45   : > { %2176 = vmatprep.mubr.msk.f32.mxu0 %vm578_vm1, %v502_v38  ;;  %v515_v38 = vld [vmem:[%s2639_s21 + $0x48] sm:$0xff] }
  0x48   : > { %2177 = vmatmul.mubr.msk.f32.gmra.mrb[8].mxu0 %vm578_vm1, %v503_v39 }
  0x49   : > { %2179 = vmatprep.mubr.msk.f32.mxu0 %vm578_vm1, %v504_v50 }
  0x4c   : > { %2180 = vmatmul.mubr.msk.f32.gmra.mrb[10].mxu0 %vm578_vm1, %v505_v51 }
  0x4d   : > { %2219 = vmatprep.mubr.msk.f32.mxu0 %vm2487_vm2, %v2486_v19 }
  0xb4   : > { %v521_v20 = vpop.permute.xlu0 %520 }
  0xb5   : > { %v531_v23 = vpop.permute.xlu1 %530 }
  0xb8   : > { %v526_v21 = vpop.permute.xlu0 %525 }
  0xb9   : > { %v536_v30 = vpop.permute.xlu1 %535 }
  0xbc   : > { %v541_v33 = vpop.permute.xlu0 %540 }
  0xbd   : > { %v546_v40 = vpop.permute.xlu1 %545 }
  0xc0   : > { %v551_v41 = vpop.permute.xlu0 %550 }
  0xc1   : > { %v556_v42 = vpop.permute.xlu1 %555 }
 0x10b   : > { %v2166_v22 = vpop.f32.mrb[0].mxu0 }
 0x10c   : > { %v690_v24 = vadd.f32 %v2166_v22, %v526_v21  ;;  %v684_v25 = vpop.f32.mrb[1].mxu0 }
 0x10d   : > { %v685_v26 = vadd.f32 %v684_v25, %v521_v20 }
 0x10e   : > { %775 = vxpose.xlu1.b32.start.end [1/1] (short) (narrow) %v690_v24, 8 }
 0x10f   : > { %v2169_v27 = vpop.f32.mrb[2].mxu0  ;;  %743 = vxpose.xlu0.b32.start.end [1/1] (short) (narrow) %v685_v26, 8 }
 0x110   : > { %v694_v28 = vpop.f32.mrb[3].mxu0  ;;  %v700_v31 = vadd.f32 %v2169_v27, %v536_v30 }
 0x111   : > { %v695_v29 = vadd.f32 %v694_v28, %v531_v23 }
 0x113   : > { %v2172_v32 = vpop.f32.mrb[4].mxu0  ;;  %807 = vxpose.xlu0.b32.start.end [1/1] (short) (narrow) %v695_v29, 8 }
 0x114   : > { %v704_v34 = vpop.f32.mrb[5].mxu0  ;;  %v710_v43 = vadd.f32 %v2172_v32, %v546_v40 }
 0x115   : > { %v705_v35 = vadd.f32 %v704_v34, %v541_v33  ;;  %v516_v34 = vld [vmem:[%s2639_s21 + $0x50] sm:$0xff] }
 0x117   : > { %v2175_v36 = vpop.f32.mrb[6].mxu0  ;;  %2183 = vmatpush3.msra.mxu1 %v705_v35  ;;  %839 = vxpose.xlu0.b32.start.end [1/1] (short) (narrow) %v700_v31, 8 }
 0x118   : > { %v714_v37 = vpop.f32.mrb[7].mxu0  ;;  %2187 = vmatprep.subr.mxu1 %v2486_v19  ;;  %v720_v48 = vadd.f32 %v2175_v36, %v556_v42  ;;  %v517_v36 = vld [vmem:[%s2639_s21 + $0x58] sm:$0xff]  ;;  %s2927_s21 = sld [smem:[#allocation6_spill]] }
 0x119   : > { %v715_v46 = vadd.f32 %v714_v37, %v551_v41 }
 0x11b   : > { %v2178_v11 = vpop.f32.mrb[8].mxu0 }
 0x11c   : > { %v724_v12 = vpop.f32.mrb[9].mxu0 }
 0x11e   : > { %s2930_s19 = sand.u32 1, %s2927_s21  }
 0x11f   : > { %v2181_v35 = vpop.f32.mrb[10].mxu0  ;;  %s1887_s20 = scalar_lea.sflag [#allocation3], %s2930_s19 }
 0x120   : > { %v734_v37 = vpop.f32.mrb[11].mxu0 }
 0x18e   : > { %v791_v45 = vpop.trf.xlu1 }
 0x18f   : > { %v759_v44 = vpop.trf.xlu0 }
 0x190   : > { %2185 = vmatmul.mubr.msk.f32.vlgmr.msra.gmra.mrb[0].mxu1 %vm871_vm3, %v759_v44 }
 0x191   : > { %2188 = vmatpush3.msra.mxu1 %v710_v43  ;;  %2189 = vmatprep.mubr.msk.f32.mxu1 %vm2487_vm2, %v2486_v19 }
 0x192   : > { %2192 = vmatprep.subr.mxu1 %v2486_v19 }
 0x193   : > { %v823_v47 = vpop.trf.xlu0 }
 0x194   : > { %2190 = vmatmul.mubr.msk.f32.vlgmr.msra.gmra.mrb[2].mxu1 %vm871_vm3, %v791_v45 }
 0x195   : > { %2193 = vmatpush3.msra.mxu1 %v715_v46  ;;  %2194 = vmatprep.mubr.msk.f32.mxu1 %vm2487_vm2, %v2486_v19 }
 0x196   : > { %2197 = vmatprep.subr.mxu1 %v2486_v19 }
 0x197   : > { %v855_v49 = vpop.trf.xlu0 }
 0x198   : > { %2195 = vmatmul.mubr.msk.f32.vlgmr.msra.gmra.mrb[4].mxu1 %vm871_vm3, %v823_v47 }
 0x199   : > { %2198 = vmatpush3.msra.mxu1 %v720_v48  ;;  %2199 = vmatprep.mubr.msk.f32.mxu1 %vm2487_vm2, %v2486_v19 }
 0x19a   : > { %2202 = vmatprep.subr.mxu1 %v2486_v19 }
 0x19c   : > { %2200 = vmatmul.mubr.msk.f32.vlgmr.msra.gmra.mrb[6].mxu1 %vm871_vm3, %v855_v49 }
 0x19d   : > { %2204 = vmatprep.mubr.msk.f32.mxu1 %vm2487_vm2, %v2486_v19 }
 0x263   : > { %v941_v52 = vpop.f32.mrb[0].mxu1 }
 0x264   : > { %v1164_v54 = vmul.f32 0.35355338, %v941_v52  ;;  %v2186_v55 = vpop.f32.mrb[1].mxu1 }
 0x266   : > { %v1175_v56 = vadd.f32 %v2094_v53, %v1164_v54 }
 0x267   : > { %v1014_v57 = vpop.f32.mrb[2].mxu1 }
 0x268   : > { %v1165_v58 = vmul.f32 0.35355338, %v1014_v57  ;;  %v2191_v59 = vpop.f32.mrb[3].mxu1  ;;  %v1179_v60 = vsel %vm871_vm3, %v1175_v56, -inf }
 0x269   : > { %1180 = vmax.xlane.f32.xlu0 %v1179_v60  ;;  %v1559_v59 = vld [vmem:[%s2644_s23] sm:$0xff]  ;;  %v1560_v60 = vld [vmem:[%s2644_s23 + $0x8] sm:$0xff] }
 0x26a   : > { %v1176_v61 = vadd.f32 %v2094_v53, %v1165_v58 }
 0x26b   : > { %v1087_v62 = vpop.f32.mrb[4].mxu1 }
 0x26c   : > { %v1166_v63 = vmul.f32 0.35355338, %v1087_v62  ;;  %v2196_v0 = vpop.f32.mrb[5].mxu1  ;;  %v1182_v2 = vsel %vm871_vm3, %v1176_v61, -inf  ;;  %v2488_v62 = vmov 0.0|0.0  }
 0x26d   : > { %1183 = vmax.xlane.f32.xlu1 %v1182_v2  ;;  %v1562_v0 = vld [vmem:[%s2644_s23 + $0x18] sm:$0xff] }
 0x26e   : > { %v1177_v3 = vadd.f32 %v2094_v53, %v1166_v63  ;;  %v2264_v63 = vpack.c.bf16 %v1560_v60, %v1559_v59 }
 0x26f   : > { %v1160_v4 = vpop.f32.mrb[6].mxu1 }
 0x270   : > { %v1167_v5 = vmul.f32 0.35355338, %v1160_v4  ;;  %v2201_v6 = vpop.f32.mrb[7].mxu1  ;;  %v1185_v7 = vsel %vm871_vm3, %v1177_v3, -inf }
 0x271   : > { %1186 = vmax.xlane.f32.xlu1 %v1185_v7 }
 0x272   : > { %v1178_v8 = vadd.f32 %v2094_v53, %v1167_v5 }
 0x274   : > { %v1188_v9 = vsel %vm871_vm3, %v1178_v8, -inf }
 0x275   : > { %1189 = vmax.xlane.f32.xlu0 %v1188_v9 }
 0x282   : > { %560 = vperm.xlu1 %2364, %v514_v10  }
 0x2f6   : > { %v1181_v13 = vpop.xlane.xlu0 %1180 }
 0x2f7   : > { %v1191_v14 = vsub.f32 %v1175_v56, %v1181_v13 }
 0x2f9   : > { %v1195_v15 = vmul.f32 1.442695, %v1191_v14 }
 0x2fa   : > { %v1184_v16 = vpop.xlane.xlu1 %1183 }
 0x2fb   : > { %2365 = vpow2.f32 %v1195_v15  ;;  %v1192_v17 = vsub.f32 %v1176_v61, %v1184_v16  ;;  %v1561_v61 = vld [vmem:[%s2644_s23 + $0x10] sm:$0xff]  ;;  %v2781_v15 = vld [vmem:[%s2660_s15] sm:$0x3f]  ;;  %s2826_s23 = scalar_lea.hbm %s2929_s24, %s2108_s26 }
 0x2fc   : > { %v2267_v2 = vpack.c.bf16 %v1562_v0, %v1561_v61 }
 0x2fd   : > { %v1197_v18 = vmul.f32 1.442695, %v1192_v17 }
 0x2fe   : > { %v1187_v20 = vpop.xlane.xlu1 %1186 }
 0x2ff   : > { %2367 = vpow2.f32 %v1197_v18  ;;  %v1193_v21 = vsub.f32 %v1177_v3, %v1187_v20 }
 0x301   : > { %v1199_v22 = vmul.f32 1.442695, %v1193_v21 }
 0x302   : > { %v1190_v23 = vpop.xlane.xlu0 %1189  ;;  %v561_v39 = vpop.permute.xlu1 %560 }
 0x303   : > { %2369 = vpow2.f32 %v1199_v22  ;;  %v1194_v24 = vsub.f32 %v1178_v8, %v1190_v23  ;;  %v725_v47 = vadd.f32 %v724_v12, %v561_v39  ;;  %v1563_v12 = vlaneseq }
 0x305   : > { %v2366_v25 = vpop.eup %2365  ;;  %v1201_v26 = vmul.f32 1.442695, %v1194_v24  ;;  %v2777_v13 = vshrl.u32 %v1563_v12, 7 }
 0x306   : > { %v1203_v27 = vsel %vm871_vm3, %v2366_v25, 0.0 }
 0x307   : > { %2371 = vpow2.f32 %v1201_v26  ;;  %1204 = vadd.xlane.f32.xlu1 %v1203_v27  ;;  %v1565_v14 = vsub.s32 0, %v2777_v13  ;;  %v1665_v27 = vld [vmem:[%s2649_s17] sm:$0xff] }
 0x309   : > { %v2368_v28 = vpop.eup %2367  ;;  %v1566_v16 = vrot.slane %v2781_v15, %v1565_v14 }
 0x30a   : > { %v1206_v29 = vsel %vm871_vm3, %v2368_v28, 0.0 }
 0x30b   : > { %1207 = vadd.xlane.f32.xlu0 %v1206_v29 }
 0x30d   : > { %v2370_v30 = vpop.eup %2369 }
 0x30e   : > { %v1209_v31 = vsel %vm871_vm3, %v2370_v30, 0.0 }
 0x30f   : > { %1210 = vadd.xlane.f32.xlu1 %v1209_v31  ;;  %v1668_v31 = vld [vmem:[%s2649_s17 + $0x18] sm:$0xff] }
 0x311   : > { %v2372_v32 = vpop.eup %2371 }
 0x312   : > { %v1212_v33 = vsel %vm871_vm3, %v2372_v32, 0.0 }
 0x313   : > { %1213 = vadd.xlane.f32.xlu0 %v1212_v33 }
 0x320   : > { %570 = vperm.xlu1 %2364, %v516_v34  }
 0x324   : > { %575 = vperm.xlu1 %2364, %v517_v36   ;;  %v1662_v36 = vsub.s32 2, %v2777_v13 }
 0x329   : > { %565 = vperm.xlu0 %2363, %v515_v38  }
 0x394   : > { %v1205_v40 = vpop.xlane.xlu1 %1204 }
 0x395   : > { %2373 = vrcp.f32 %v1205_v40  ;;  %v1663_v40 = vrot.slane %v2781_v15, %v1662_v36 }
 0x398   : > { %v1208_v41 = vpop.xlane.xlu0 %1207 }
 0x399   : > { %2375 = vrcp.f32 %v1208_v41 }
 0x39c   : > { %v1211_v42 = vpop.xlane.xlu1 %1210 }
 0x39d   : > { %2377 = vrcp.f32 %v1211_v42 }
 0x39f   : > { %v2374_v43 = vpop.eup %2373 }
 0x3a0   : > { %v1219_v44 = vmul.f32 %v2374_v43, %v2366_v25  ;;  %v1214_v45 = vpop.xlane.xlu0 %1213  ;;  %v571_v49 = vpop.permute.xlu1 %570  ;;  %v1775_v43 = vld [vmem:[%s2654_s11] sm:$0xff] }
 0x3a1   : > { %2379 = vrcp.f32 %v1214_v45  ;;  %v735_v57 = vadd.f32 %v734_v37, %v571_v49  ;;  %v1779_v49 = vld [vmem:[%s2654_s11 + $0x20] sm:$0xff] }
 0x3a2   : > { %2203 = vmatpush3.xpose.msk.msra.mxu1 %vm871_vm3, %v1219_v44  ;;  %v1776_v44 = vld [vmem:[%s2654_s11 + $0x8] sm:$0xff] }
 0x3a3   : > { %v2376_v46 = vpop.eup %2375  ;;  %2207 = vmatprep.subr.mxu1 %v2486_v19  ;;  %v2276_v45 = vpack.c.bf16 %v1776_v44, %v1775_v43 }
 0x3a4   : > { %v1220_v48 = vmul.f32 %v2376_v46, %v2368_v28  ;;  %v576_v56 = vpop.permute.xlu1 %575  ;;  %v1666_v28 = vld [vmem:[%s2649_s17 + $0x8] sm:$0xff]  ;;  %v1777_v46 = vld [vmem:[%s2654_s11 + $0x10] sm:$0xff] }
 0x3a5   : > { %2205 = vmatmul.mubr.msk.f32.vlgmr.msra.gmra.mrb[8].mxu1 %vm871_vm3, %v725_v47  ;;  %v740_v58 = vadd.f32 %v2181_v35, %v576_v56  ;;  %v2270_v29 = vpack.c.bf16 %v1666_v28, %v1665_v27  ;;  %v1657_v35 = vsub.s32 1, %v2777_v13  ;;  %v1778_v47 = vld [vmem:[%s2654_s11 + $0x18] sm:$0xff] }
 0x3a6   : > { %2208 = vmatpush3.xpose.msk.msra.mxu1 %vm871_vm3, %v1220_v48  ;;  %2209 = vmatprep.mubr.msk.f32.mxu1 %vm2487_vm2, %v2486_v19  ;;  %v2279_v48 = vpack.c.bf16 %v1778_v47, %v1777_v46 }
 0x3a7   : > { %v2378_v50 = vpop.eup %2377  ;;  %2212 = vmatprep.subr.mxu1 %v2486_v19  ;;  %v1658_v37 = vrot.slane %v2781_v15, %v1657_v35 }
 0x3a8   : > { %v1221_v51 = vmul.f32 %v2378_v50, %v2370_v30  ;;  %v566_v52 = vpop.permute.xlu0 %565  ;;  %v1667_v30 = vld [vmem:[%s2649_s17 + $0x10] sm:$0xff]  ;;  %v1780_v50 = vld [vmem:[%s2654_s11 + $0x28] sm:$0xff]  ;;  %s2389_s17 = scalar_lea.vmem %s2828_s27, 128 }
 0x3a9   : > { %v730_v53 = vadd.f32 %v2178_v11, %v566_v52  ;;  %v1781_v52 = vld [vmem:[%s2654_s11 + $0x30] sm:$0xff]  ;;  %p2390_p1 = scmp.ne.s32.totalorder %s2828_s27, %s2389_s17 }
 0x3ab   : > { %v2380_v54 = vpop.eup %2379  ;;  %2210 = vmatmul.mubr.msk.f32.vlgmr.msra.gmra.mrb[10].mxu1 %vm871_vm3, %v730_v53  ;;  %v1782_v53 = vld [vmem:[%s2654_s11 + $0x38] sm:$0xff]  ;;  %p2391_p2 = pnand %p2390_p1, %p2589_p3  ;;  %s2393_s11 = sshll.u32 %s2489_s13, 4  ;;  %s2394_s11 = int_to_ptr.vmem [resolvable:$false] %s2393_s11 }
 0x3ac   : > { %v1222_v55 = vmul.f32 %v2380_v54, %v2372_v32  ;;  %2213 = vmatpush3.xpose.msk.msra.mxu1 %vm871_vm3, %v1221_v51  ;;  %2214 = vmatprep.mubr.msk.f32.mxu1 %vm2487_vm2, %v2486_v19  ;;  %v2282_v51 = vpack.c.bf16 %v1780_v50, %v1779_v49  ;;  %v2285_v54 = vpack.c.bf16 %v1782_v53, %v1781_v52  ;;  %s2395_s22 = scalar_lea.vmem %s2394_s11, 256  ;;  %p2396_p5 = scmp.lt.s32.totalorder %s2828_s27, %s2394_s11 }
 0x3ad   : > { %2275 = vmatprep.subr.bf16.mxu1 %v2488_v62  ;;  %p2392_p4 = pneg %p2391_p2  ;;  %p2397_p6 = scmp.lt.s32.totalorder %s2395_s22, %s2389_s17 }
 0x3ae   : > { %2218 = vmatpush3.xpose.msk.msra.mxu0 %vm871_vm3, %v1222_v55  ;;  %v2104_v55 = vld [vmem:[%s484_s18] ss:$0 sm:$0xff] }
 0x3af   : > { %2215 = vmatmul.mubr.msk.f32.vlgmr.msra.gmra.mrb[12].mxu1 %vm871_vm3, %v735_v57  ;;  %2263 = vmatprep.subr.bf16.mxu0 %v2488_v62  ;;  %p2398_p7 = por %p2397_p6, %p2396_p5 }
 0x3b0   : > { %2260 = vmatprep.mubr.msk.f32.mxu1 %vm2487_vm2, %v2486_v19  ;;  %2277 = vmatpush3.bf16.msra.mxu1 %v2276_v45 }
 0x3b1   : > { %2220 = vmatmul.mubr.msk.f32.vlgmr.msra.gmra.mrb[12].mxu0 %vm871_vm3, %v740_v58  ;;  %2278 = vmatprep.subr.bf16.mxu1 %v2488_v62  ;;  %p2399_p8 = pnand %p2398_p7, %p2392_p4 }
 0x3b2   : > { %2230 = vmatprep.mubr.msk.f32.mxu0 %vm2487_vm2, %v2486_v19  ;;  %2265 = vmatpush3.bf16.msra.mxu0 %v2264_v63 }
 0x3b3   : > { %2266 = vmatprep.subr.bf16.mxu0 %v2488_v62 }
 0x3b4   : > { %2280 = vmatpush3.bf16.msra.mxu1 %v2279_v48 }
 0x3b5   : > { %2281 = vmatprep.subr.bf16.mxu1 %v2488_v62 }
 0x3b6   : > { %2268 = vmatpush3.bf16.msra.mxu0 %v2267_v2 }
 0x3b7   : > { %2269 = vmatprep.subr.bf16.mxu0 %v2488_v62 }
 0x3b8   : > { %2283 = vmatpush3.bf16.msra.mxu1 %v2282_v51 }
 0x3b9   : > { %2284 = vmatprep.subr.bf16.mxu1 %v2488_v62 }
 0x3bc   : > { %2286 = vmatpush3.bf16.msra.mxu1 %v2285_v54 }
 0x478   : > { %v1295_v3 = vpop.f32.mrb[8].mxu1 }
 0x479   : > { %v2206_v4 = vpop.f32.mrb[9].mxu1  ;;  %1527 = vxpose.xlu0.b32.start [1/4] (short) (narrow) %v1295_v3, 8 }
 0x47e   : > { %v1371_v5 = vpop.f32.mrb[10].mxu1 }
 0x47f   : > { %1528 = vxpose.xlu0.b32.cont [2/4] (short) (narrow) %v1371_v5, 8  ;;  %v2211_v6 = vpop.f32.mrb[11].mxu1 }
 0x482   : > { %v1447_v7 = vpop.f32.mrb[12].mxu1 }
 0x483   : > { %1529 = vxpose.xlu0.b32.cont [3/4] (short) (narrow) %v1447_v7, 8  ;;  %v2216_v8 = vpop.f32.mrb[13].mxu1 }
 0x484   : > { %v1523_v9 = vpop.f32.mrb[12].mxu0 }
 0x485   : > { %v2221_v10 = vpop.f32.mrb[13].mxu0 }
 0x487   : > { %1530 = vxpose.xlu0.b32.end [4/4] (short) (narrow) %v1523_v9, 8 }
 0x4fb   : > { %v1543_v11 = vpop.trf.xlu0 }
 0x4fc   : > { %2231 = vmatmul.mubr.msk.f32.vlgmr.msra.gmra.mrb[14].mxu0 %vm578_vm1, %v1543_v11 }
 0x4fd   : > { %2241 = vmatprep.mubr.msk.f32.mxu0 %vm2487_vm2, %v2486_v19  ;;  %2271 = vmatpush3.bf16.msra.mxu0 %v2270_v29 }
 0x4fe   : > { %2272 = vmatprep.subr.bf16.mxu0 %v2488_v62 }
 0x5cf   : > { %v1636_v17 = vpop.f32.mrb[14].mxu0 }
 0x5d0   : > { %v1637_v18 = vadd.f32 %v1636_v17, %v1566_v16  ;;  %v2232_v20 = vpop.f32.mrb[15].mxu0 }
 0x5d2   : > { %v1640_v21 = vadd.f32 %v1637_v18, %v2671_v1  ;;  %v2273_v1 = vpack.c.bf16 %v1668_v31, %v1667_v30 }
 0x5d4   : > { %v1641_v19 = vsel %vm578_vm1, %v1640_v21, 0.0  ;;  %2274 = vmatpush3.bf16.msra.mxu0 %v2273_v1 }
 0x5d5   : > { %1642 = vadd.xlane.f32.xlu1 %v1641_v19 }
 0x662   : > { %v1643_v22 = vpop.xlane.xlu1 %1642 }
 0x663   : > { %v1645_v23 = vmul.f32 0.03125, %v1643_v22 }
 0x665   : > { %v1646_v24 = vsub.f32 %v1640_v21, %v1645_v23  ;;  %v1785_v23 = vsub.s32 3, %v2777_v13 }
 0x667   : > { %v1647_v25 = vmul.f32 %v1646_v24, %v1646_v24 }
 0x669   : > { %v1648_v26 = vsel %vm578_vm1, %v1647_v25, 0.0 }
 0x66a   : > { %1649 = vadd.xlane.f32.xlu1 %v1648_v26 }
 0x6f7   : > { %v1650_v32 = vpop.xlane.xlu1 %1649 }
 0x6f8   : > { %v1651_v33 = vmul.f32 0.03125, %v1650_v32 }
 0x6fa   : > { %v1652_v34 = vadd.f32 1e-12, %v1651_v33 }
 0x6fc   : > { %2381 = vrsqrt.f32 %v1652_v34 }
 0x706   : > { %v2382_v38 = vpop.eup %2381 }
 0x707   : > { %v1654_v39 = vmul.f32 %v2382_v38, %v1646_v24  ;;  %v1786_v24 = vrot.slane %v2781_v15, %v1785_v23  ;;  %v1882_v38 = vsub.s32 5, %v2777_v13 }
 0x709   : > { %v1659_v41 = vmul.f32 %v1658_v37, %v1654_v39  ;;  %v1877_v37 = vsub.s32 4, %v2777_v13 }
 0x70b   : > { %v1664_v42 = vadd.f32 %v1663_v40, %v1659_v41  ;;  %v1878_v39 = vrot.slane %v2781_v15, %v1877_v37 }
 0x70d   : > { %2242 = vmatmul.mubr.msk.f32.vlgmr.msra.gmra.mrb[16].mxu0 %vm578_vm1, %v1664_v42 }
 0x7e0   : > { %v1745_v56 = vpop.f32.mrb[16].mxu0 }
 0x7e1   : > { %v1746_v57 = vadd.f32 %v2104_v55, %v1745_v56  ;;  %v2243_v58 = vpop.f32.mrb[17].mxu0 }
 0x7e3   : > { %v1750_v59 = vmul.f32 0.70710677, %v1746_v57  ;;  %v1749_v21 = vmul.f32 0.5, %v1746_v57 }
 0x7e5   : > { %v1751_v60 = vand.u32 2147483647, %v1750_v59  ;;  %vm1770_vm4 = vcmp.lt.f32.partialorder %v1750_v59, 0.0 }
 0x7e7   : > { %v1752_v61 = vmul.f32 0.3275911, %v1751_v60  ;;  %v1764_v0 = vsub.f32 0.0, %v1751_v60 }
 0x7e9   : > { %v1753_v63 = vadd.f32 1.0, %v1752_v61  ;;  %v1765_v62 = vmul.f32 %v1764_v0, %v1751_v60 }
 0x7eb   : > { %2383 = vrcp.f32 %v1753_v63  ;;  %v1766_v5 = vmul.f32 1.442695, %v1765_v62 }
 0x7ed   : > { %2385 = vpow2.f32 %v1766_v5 }
 0x7f5   : > { %v2384_v2 = vpop.eup %2383 }
 0x7f6   : > { %v1755_v3 = vmul.f32 1.0614054, %v2384_v2 }
 0x7f7   : > { %v2386_v14 = vpop.eup %2385 }
 0x7f8   : > { %v1756_v4 = vadd.f32 -1.4531521, %v1755_v3 }
 0x7fa   : > { %v1757_v6 = vmul.f32 %v2384_v2, %v1756_v4 }
 0x7fc   : > { %v1758_v7 = vadd.f32 1.4214138, %v1757_v6 }
 0x7fe   : > { %v1759_v8 = vmul.f32 %v2384_v2, %v1758_v7 }
 0x800   : > { %v1760_v9 = vadd.f32 -0.28449672, %v1759_v8 }
 0x802   : > { %v1761_v10 = vmul.f32 %v2384_v2, %v1760_v9 }
 0x804   : > { %v1762_v11 = vadd.f32 0.2548296, %v1761_v10 }
 0x806   : > { %v1763_v12 = vmul.f32 %v2384_v2, %v1762_v11 }
 0x808   : > { %v1768_v16 = vmul.f32 %v2386_v14, %v1763_v12 }
 0x80a   : > { %v1769_v17 = vsub.f32 1.0, %v1768_v16 }
 0x80c   : > { %v1771_v18 = vsub.f32 0.0, %v1769_v17 }
 0x80e   : > { %v1772_v20 = vsel %vm1770_vm4, %v1771_v18, %v1769_v17 }
 0x80f   : > { %v1773_v19 = vadd.f32 1.0, %v1772_v20 }
 0x811   : > { %v1774_v22 = vmul.f32 %v1773_v19, %v1749_v21 }
 0x813   : > { %2261 = vmatmul.mubr.msk.f32.vlgmr.msra.gmra.mrb[14].mxu1 %vm1787_vm5, %v1774_v22 }
 0x8e6   : > { %v1857_v25 = vpop.f32.mrb[14].mxu1 }
 0x8e7   : > { %v1858_v26 = vadd.f32 %v1857_v25, %v1786_v24  ;;  %v2262_v27 = vpop.f32.mrb[15].mxu1 }
 0x8e9   : > { %v1861_v28 = vadd.f32 %v1858_v26, %v1664_v42  ;;  %v1883_v42 = vrot.slane %v2781_v15, %v1882_v38 }
 0x8eb   : > { %v1862_v29 = vsel %vm578_vm1, %v1861_v28, 0.0 }
 0x8ec   : > { %1863 = vadd.xlane.f32.xlu1 %v1862_v29 }
 0x979   : > { %v1864_v30 = vpop.xlane.xlu1 %1863 }
 0x97a   : > { %v1865_v31 = vmul.f32 0.03125, %v1864_v30 }
 0x97c   : > { %v1866_v1 = vsub.f32 %v1861_v28, %v1865_v31 }
 0x97e   : > { %v1867_v32 = vmul.f32 %v1866_v1, %v1866_v1 }
 0x980   : > { %v1868_v33 = vsel %vm578_vm1, %v1867_v32, 0.0 }
 0x981   : > { %1869 = vadd.xlane.f32.xlu0 %v1868_v33 }
 0xa0e   : > { %v1870_v34 = vpop.xlane.xlu0 %1869 }
 0xa0f   : > { %v1871_v35 = vmul.f32 0.03125, %v1870_v34 }
 0xa11   : > { %v1872_v36 = vadd.f32 1e-12, %v1871_v35 }
 0xa13   : > { %2387 = vrsqrt.f32 %v1872_v36 }
 0xa1d   : > { %v2388_v40 = vpop.eup %2387 }
 0xa1e   : > { %v1874_v41 = vmul.f32 %v2388_v40, %v1866_v1 }
 0xa20   : > { %v1879_v43 = vmul.f32 %v1878_v39, %v1874_v41 }
 0xa22   : > { %v1884_v44 = vadd.f32 %v1883_v42, %v1879_v43 }
 0xa24   : > { %1885 = vst.msk [vmem:[%s2666_s3] sm:$0xff] %vm578_vm1, %v1884_v44 }
 0xa25   : > { %2402 = shalt.err (!%p2399_p8)
}
 0xa26   : > { %s2403_s3 = scalar_lea.hbm %s2826_s23, 128  ;;  %s2407_s16 = scalar_lea.hbm %s2929_s24, 256 }
 0xa27   : > { %p2404_p10 = scmp.ne.s32.totalorder %s2826_s23, %s2403_s3  ;;  %p2408_p13 = scmp.lt.u32.totalorder %s2826_s23, %s2929_s24 }
 0xa28   : > { %p2409_p0 = scmp.lt.u32.totalorder %s2407_s16, %s2403_s3  ;;  %p2411_p2 = scmp.lt.u32.totalorder %s2403_s3, %s2826_s23 }
 0xa29   : > { %p2405_p11 = pnand %p2404_p10, %p2589_p3 }
 0xa2a   : > { %p2410_p1 = por %p2409_p0, %p2408_p13 }
 0xa2b   : > { %p2406_p12 = pneg %p2405_p11 }
 0xa2c   : > { %p2412_p4 = por %p2411_p2, %p2410_p1 }
 0xa2e   : > { %p2413_p5 = pnand %p2412_p4, %p2406_p12 }
 0xa30   : > { %2416 = shalt.err (!%p2413_p5)
}
 0xa31   : > { %2288 = dma.vmem_to_hbm [thread:$0]  (%p2589_p3), %s2828_s27, 128, %s2826_s23, %s1887_s20  }
 0xa32 PF: > { %s2931_s0 = sld [smem:[#allocation10_spill]]  ;;  %s2932_s2 = sld [smem:[#allocation5_spill]] }
 0xa38   : > { %p2294_p6 = scmp.ge.s32.totalorder %s2931_s0, 2  ;;  %s1912_s30 = sand.u32 1, %s2932_s2  }
 0xa39   : > { %s1913_s14 = scalar_lea.sflag [#allocation3], %s1912_s30 }
 0xa3a   : > { %p2291_p7 = pnand %p2294_p6, %p2599_p9 }
 0xa3c   : > { %2450 = dma.done.wait (!%p2291_p7), %s1913_s14, 128  }
 0xa3d   : > { %2452 = vsyncadd (!%p2291_p7), %s1913_s14, 4294967168  ;;  %s22_s16 = sadd.s32 1, %s2931_s0   ;;  %s2934_s30 = sld [smem:[#allocation6_spill]] }
 0xa3e   : > { %p19_p8 = scmp.ge.s32.totalorder %s22_s16, 6   ;;  %s2935_s10 = sld [smem:[#allocation7_spill]] }
 0xa3f   : > { %s2936_s11 = sld [smem:[#allocation15_spill]]  ;;  %s2937_s12 = sld [smem:[#allocation8_spill]] }
 0xa40   : > { %s2938_s13 = sld [smem:[#allocation9_spill]]  ;;  %s2939_s14 = sld [smem:[#allocation11_spill]] }
 0xa41   : > { %s2940_s15 = sld [smem:[#allocation13_spill]]  ;;  %21 = sbr.rel (!%p19_p8) target bundleno = 10 (0xa), region = 119 }
 0xa48   :  { %1918 = vsyncpa [#allocation3], 1 }
 0xa49   :  { %1920 = vsyncpa [#allocation3 + $0x1], 1 }

</bundles_post_ra>
